<compile_context>
chip_gen: v6e
topology: v6e:2x2x1
jax: 0.10.0
libtpu: 0.0.40
codegen_flags: <defaults>
</compile_context>

<pallas_src>
import functools

import jax
import jax.numpy as jnp
from jax.experimental import pallas as pl
from jax.experimental.pallas import tpu as pltpu

IGNORE_INDEX = 255


def _vmem_limit_and_budget():
    """Generation-aware VMEM limit and pipeline byte budget."""
    try:
        cap = int(pltpu.get_tpu_info().vmem_capacity_bytes)
    except Exception:
        cap = 64 * 1024 * 1024  # conservative fallback (v7x-sized)
    # 64 MiB limit on 128 MiB parts (v5e/v6e), 32 MiB on v7x (64 MiB per TC).
    limit = min(cap // 2, 64 * 1024 * 1024)
    # Half of the limit feeds the double-buffered tiles; rest is headroom.
    return limit, limit // 2


def _dual_ce_kernel(out_ref, aux_ref, tgt_ref, loss_ref, cnt_ref, *,
                    tile_r, total_r, n_ri, row_mask, fold):
    """Accumulates per-pixel (nll_out + nll_aux) and the valid-pixel count,
    masked by ignore_index (and by ragged-row padding), into small per-(batch,
    parallel-half) f32 accumulators revisited across the arbitrary grid axis."""
    @pl.when(pl.program_id(2) == 0)
    def _():
        loss_ref[...] = jnp.zeros_like(loss_ref)
        cnt_ref[...] = jnp.zeros_like(cnt_ref)

    t = tgt_ref[...]                                        # (tile_r, L) int32
    valid = t != IGNORE_INDEX
    if row_mask:
        # Ragged last pixel-row block: mask rows past the real extent.
        r_blk = pl.program_id(1) * n_ri + pl.program_id(2)
        row = jax.lax.broadcasted_iota(jnp.int32, t.shape, 0)
        valid = valid & ((r_blk * tile_r + row) < total_r)

    # One-hot of the target class: computed ONCE, reused by both heads.
    c = out_ref.shape[0]
    cls = jax.lax.broadcasted_iota(jnp.int32, (c,) + t.shape, 0)
    onehot = cls == t[None, :, :]

    def nll(ref):
        x = ref[...]                                        # native dtype (C, tile_r, L)
        m = jnp.max(x, axis=0)                              # leading-axis max: pure VPU
        # Cast fused into the subtract (no staged full-tile f32 copy).
        xs = x.astype(jnp.float32) - m.astype(jnp.float32)[None, :, :]
        lse = jnp.log(jnp.sum(jnp.exp(xs), axis=0))         # logsumexp(x - m)
        picked = jnp.sum(jnp.where(onehot, xs, 0.0), axis=0)  # x[target] - m
        return lse - picked                                 # -log_softmax[target]

    # Per-pixel select (NOT multiply) so OOB/ignored garbage never contaminates.
    per_pix = jnp.where(valid, nll(out_ref) + nll(aux_ref), 0.0)   # (tile_r, L)
    ones = jnp.where(valid, 1.0, 0.0)

    def _fold(v):
        if fold:
            # Fold rows into 8 sublanes (vreg-aligned, pure VPU) so the
            # accumulator / HBM writeback stays tiny.
            return v.reshape(tile_r // 8, 8, v.shape[-1]).sum(axis=0)
        return v

    loss_ref[...] += _fold(per_pix)
    cnt_ref[...] += _fold(ones)


def _dual_ce_sums(out_logits, aux_logits, targets_i32):
    """Returns (loss-sum accumulator, valid-count accumulator)."""
    n, c, h, w = out_logits.shape
    hw = h * w

    # Lane-dense pixel layout when possible (free bitcast reshapes).
    if hw % 128 == 0:
        l, r = 128, hw // 128
    else:
        l, r = w, h
    out_r = out_logits.reshape(n, c, r, l)
    aux_r = aux_logits.reshape(n, c, r, l)
    tgt_r = targets_i32.reshape(n, r, l)

    itemsize = jnp.dtype(out_logits.dtype).itemsize
    sub = max(8, 32 // max(itemsize, 1))        # 8 f32, 16 bf16, 32 int8
    limit, budget = _vmem_limit_and_budget()

    # Bytes per unit of tile_r: 2 logits inputs x 2 buffers + targets (i32, x2)
    # + 2 f32 accumulator blocks (worst case, x2).
    per_r = l * (4 * c * itemsize + 24)
    cap = max(sub, (budget // per_r) // sub * sub)
    tile_r = r if r <= cap else cap
    n_r = pl.cdiv(r, tile_r)

    # Prefer an even block count so the pixel-row split keeps both v7x
    # TensorCores busy even at batch size 1 (harmless on v5e/v6e).
    if n_r > 1 and n_r % 2 == 1:
        alt = (((r + n_r) // (n_r + 1)) + sub - 1) // sub * sub
        alt = max(alt, sub)
        if alt <= tile_r and pl.cdiv(r, alt) % 2 == 0:
            tile_r = alt
            n_r = pl.cdiv(r, alt)
    n_p = 2 if (n_r >= 2 and n_r % 2 == 0) else 1
    n_ri = n_r // n_p

    fold = (tile_r % 8 == 0)
    acc_r = 8 if fold else tile_r
    row_mask = (n_r * tile_r != r)

    kernel = functools.partial(
        _dual_ce_kernel, tile_r=tile_r, total_r=r, n_ri=n_ri,
        row_mask=row_mask, fold=fold)

    loss_acc, cnt_acc = pl.pallas_call(
        kernel,
        out_shape=(jax.ShapeDtypeStruct((n, n_p, acc_r, l), jnp.float32),
                   jax.ShapeDtypeStruct((n, n_p, acc_r, l), jnp.float32)),
        grid=(n, n_p, n_ri),
        in_specs=[
            pl.BlockSpec((None, c, tile_r, l),
                         lambda b, p, i: (b, 0, p * n_ri + i, 0)),
            pl.BlockSpec((None, c, tile_r, l),
                         lambda b, p, i: (b, 0, p * n_ri + i, 0)),
            pl.BlockSpec((None, tile_r, l),
                         lambda b, p, i: (b, p * n_ri + i, 0)),
        ],
        out_specs=[
            pl.BlockSpec((None, None, acc_r, l), lambda b, p, i: (b, p, 0, 0)),
            pl.BlockSpec((None, None, acc_r, l), lambda b, p, i: (b, p, 0, 0)),
        ],
        compiler_params=pltpu.CompilerParams(
            dimension_semantics=("parallel", "parallel", "arbitrary"),
            vmem_limit_bytes=limit,
        ),
    )(out_r, aux_r, tgt_r)
    return loss_acc, cnt_acc


@functools.partial(jax.jit, static_argnames=("aux_weight",))
def cross_entropy_loss_aux(outputs, targets, aux_weight=0.4):
    """loss + loss_aux, each F.cross_entropy(..., reduction='mean', ignore_index=255)."""
    del aux_weight  # declared in the PyTorch module but unused by its forward
    t = targets.astype(jnp.int32)
    loss_acc, cnt_acc = _dual_ce_sums(outputs["out"], outputs["aux"], t)
    # Both terms share the same valid count, so:
    #   loss + loss_aux == (sum_out + sum_aux) / valid_cnt
    return jnp.sum(loss_acc, dtype=jnp.float32) / jnp.sum(cnt_acc, dtype=jnp.float32)


def _reference(outputs, targets):
    """Pure-JAX reference for sanity checking."""
    def ce(logits, tgt):
        _, c, _, _ = logits.shape
        x = jnp.transpose(logits, (0, 2, 3, 1)).reshape(-1, c).astype(jnp.float32)
        t = tgt.reshape(-1).astype(jnp.int32)
        lse = jax.scipy.special.logsumexp(x, axis=-1)
        picked = jnp.take_along_axis(
            x, jnp.clip(t, 0, c - 1)[:, None], axis=-1)[:, 0]
        valid = t != IGNORE_INDEX
        nll = jnp.where(valid, lse - picked, 0.0)
        return jnp.sum(nll) / jnp.sum(valid.astype(jnp.float32))

    return ce(outputs["out"], targets) + ce(outputs["aux"], targets)


if __name__ == "__main__":
    key = jax.random.PRNGKey(0)
    k_out, k_aux, k_tgt, k_ign = jax.random.split(key, 4)

    N, C, H, W = 2, 4, 16, 16
    outputs = {
        "out": jax.random.normal(k_out, (N, C, H, W), dtype=jnp.float32),
        "aux": jax.random.normal(k_aux, (N, C, H, W), dtype=jnp.float32),
    }
    targets = jax.random.randint(k_tgt, (N, H, W), 0, C, dtype=jnp.int32)
    # sprinkle some ignore_index pixels to exercise the mask
    ignore_mask = jax.random.uniform(k_ign, (N, H, W)) < 0.1
    targets = jnp.where(ignore_mask, IGNORE_INDEX, targets)

    loss = cross_entropy_loss_aux(outputs, targets)
    jax.block_until_ready(loss)

    ref = _reference(outputs, targets)
    assert jnp.allclose(loss, ref, rtol=1e-5, atol=1e-5), (loss, ref)

    print("KERNEL_OK")
</pallas_src>

<mosaic_0001>
module attributes {stable_mosaic.version = 11 : i64} {
  func.func @_dual_ce_kernel(%arg0: i32, %arg1: i32, %arg2: i32, %arg3: memref<1x4x2x128xf32, #tpu.memory_space<vmem>>, %arg4: memref<1x4x2x128xf32, #tpu.memory_space<vmem>>, %arg5: memref<1x2x128xi32, #tpu.memory_space<vmem>>, %arg6: memref<1x1x2x128xf32, #tpu.memory_space<vmem>>, %arg7: memref<1x1x2x128xf32, #tpu.memory_space<vmem>>) attributes {dimension_semantics = [#tpu.dimension_semantics<parallel>, #tpu.dimension_semantics<parallel>, #tpu.dimension_semantics<arbitrary>], iteration_bounds = array<i64: 2, 1, 1>, scalar_prefetch = 0 : i64, scratch_operands = 0 : i64, tpu.core_type = #tpu.core_type<tc>, window_params = [{transform_indices = @transform_0, window_bounds = array<i64: 1, 4, 2, 128>}, {transform_indices = @transform_1, window_bounds = array<i64: 1, 4, 2, 128>}, {transform_indices = @transform_2, window_bounds = array<i64: 1, 2, 128>}, {transform_indices = @transform_3, window_bounds = array<i64: 1, 1, 2, 128>}, {transform_indices = @transform_4, window_bounds = array<i64: 1, 1, 2, 128>}]} {
    %c0_i32 = arith.constant 0 : i32
    %0 = arith.cmpi eq, %arg2, %c0_i32 : i32
    %1 = arith.extui %0 : i1 to i32
    %c0_i32_0 = arith.constant 0 : i32
    %2 = arith.cmpi ne, %1, %c0_i32_0 : i32
    scf.if %2 {
      %cst_37 = arith.constant 0.000000e+00 : f32
      %55 = vector.broadcast %cst_37 : f32 to vector<2x128xf32>
      %c0_38 = arith.constant 0 : index
      %c0_39 = arith.constant 0 : index
      %c0_40 = arith.constant 0 : index
      %c0_41 = arith.constant 0 : index
      %56 = vector.load %arg6[%c0_38, %c0_39, %c0_40, %c0_41] : memref<1x1x2x128xf32, #tpu.memory_space<vmem>>, vector<1x1x2x128xf32>
      %57 = vector.shape_cast %56 : vector<1x1x2x128xf32> to vector<2x128xf32>
      %58 = vector.shape_cast %55 : vector<2x128xf32> to vector<1x1x2x128xf32>
      tpu.vector_store %arg6[%c0_38, %c0_39, %c0_40, %c0_41], %58 {strides = array<i32>} : memref<1x1x2x128xf32, #tpu.memory_space<vmem>>, vector<1x1x2x128xf32>,
      %cst_42 = arith.constant 0.000000e+00 : f32
      %59 = vector.broadcast %cst_42 : f32 to vector<2x128xf32>
      %c0_43 = arith.constant 0 : index
      %c0_44 = arith.constant 0 : index
      %c0_45 = arith.constant 0 : index
      %c0_46 = arith.constant 0 : index
      %60 = vector.load %arg7[%c0_43, %c0_44, %c0_45, %c0_46] : memref<1x1x2x128xf32, #tpu.memory_space<vmem>>, vector<1x1x2x128xf32>
      %61 = vector.shape_cast %60 : vector<1x1x2x128xf32> to vector<2x128xf32>
      %62 = vector.shape_cast %59 : vector<2x128xf32> to vector<1x1x2x128xf32>
      tpu.vector_store %arg7[%c0_43, %c0_44, %c0_45, %c0_46], %62 {strides = array<i32>} : memref<1x1x2x128xf32, #tpu.memory_space<vmem>>, vector<1x1x2x128xf32>,
    } else {
    }
    %c0 = arith.constant 0 : index
    %c0_1 = arith.constant 0 : index
    %c0_2 = arith.constant 0 : index
    %3 = vector.load %arg5[%c0, %c0_1, %c0_2] : memref<1x2x128xi32, #tpu.memory_space<vmem>>, vector<1x2x128xi32>
    %4 = vector.shape_cast %3 : vector<1x2x128xi32> to vector<2x128xi32>
    %c255_i32 = arith.constant 255 : i32
    %5 = vector.broadcast %c255_i32 : i32 to vector<2x128xi32>
    %6 = arith.cmpi ne, %4, %5 : vector<2x128xi32>
    %7 = tpu.iota {dimensions = array<i32: 0>} : vector<4x2x128xi32>
    %8 = vector.shape_cast %4 : vector<2x128xi32> to vector<1x2x128xi32>
    %9 = vector.broadcast %8 : vector<1x2x128xi32> to vector<4x2x128xi32>
    %10 = arith.cmpi eq, %7, %9 : vector<4x2x128xi32>
    %c0_3 = arith.constant 0 : index
    %c0_4 = arith.constant 0 : index
    %c0_5 = arith.constant 0 : index
    %c0_6 = arith.constant 0 : index
    %11 = vector.load %arg3[%c0_3, %c0_4, %c0_5, %c0_6] : memref<1x4x2x128xf32, #tpu.memory_space<vmem>>, vector<1x4x2x128xf32>
    %12 = vector.shape_cast %11 : vector<1x4x2x128xf32> to vector<4x2x128xf32>
    %cst = arith.constant dense<0xFF800000> : vector<2x128xf32>
    %13 = vector.multi_reduction <maximumf>, %12, %cst [0] : vector<4x2x128xf32> to vector<2x128xf32>
    %14 = vector.shape_cast %13 : vector<2x128xf32> to vector<1x2x128xf32>
    %15 = vector.broadcast %14 : vector<1x2x128xf32> to vector<4x2x128xf32>
    %16 = arith.subf %12, %15 : vector<4x2x128xf32>
    %17 = math.exp %16 : vector<4x2x128xf32>
    %cst_7 = arith.constant dense<0.000000e+00> : vector<2x128xf32>
    %18 = vector.multi_reduction <add>, %17, %cst_7 [0] : vector<4x2x128xf32> to vector<2x128xf32>
    %19 = math.log %18 : vector<2x128xf32>
    %cst_8 = arith.constant 0.000000e+00 : f32
    %20 = vector.broadcast %cst_8 : f32 to vector<4x2x128xf32>
    %21 = arith.select %10, %16, %20 : vector<4x2x128xi1>, vector<4x2x128xf32>
    %cst_9 = arith.constant dense<0.000000e+00> : vector<2x128xf32>
    %22 = vector.multi_reduction <add>, %21, %cst_9 [0] : vector<4x2x128xf32> to vector<2x128xf32>
    %23 = arith.subf %19, %22 : vector<2x128xf32>
    %c0_10 = arith.constant 0 : index
    %c0_11 = arith.constant 0 : index
    %c0_12 = arith.constant 0 : index
    %c0_13 = arith.constant 0 : index
    %24 = vector.load %arg4[%c0_10, %c0_11, %c0_12, %c0_13] : memref<1x4x2x128xf32, #tpu.memory_space<vmem>>, vector<1x4x2x128xf32>
    %25 = vector.shape_cast %24 : vector<1x4x2x128xf32> to vector<4x2x128xf32>
    %cst_14 = arith.constant dense<0xFF800000> : vector<2x128xf32>
    %26 = vector.multi_reduction <maximumf>, %25, %cst_14 [0] : vector<4x2x128xf32> to vector<2x128xf32>
    %27 = vector.shape_cast %26 : vector<2x128xf32> to vector<1x2x128xf32>
    %28 = vector.broadcast %27 : vector<1x2x128xf32> to vector<4x2x128xf32>
    %29 = arith.subf %25, %28 : vector<4x2x128xf32>
    %30 = math.exp %29 : vector<4x2x128xf32>
    %cst_15 = arith.constant dense<0.000000e+00> : vector<2x128xf32>
    %31 = vector.multi_reduction <add>, %30, %cst_15 [0] : vector<4x2x128xf32> to vector<2x128xf32>
    %32 = math.log %31 : vector<2x128xf32>
    %cst_16 = arith.constant 0.000000e+00 : f32
    %33 = vector.broadcast %cst_16 : f32 to vector<4x2x128xf32>
    %34 = arith.select %10, %29, %33 : vector<4x2x128xi1>, vector<4x2x128xf32>
    %cst_17 = arith.constant dense<0.000000e+00> : vector<2x128xf32>
    %35 = vector.multi_reduction <add>, %34, %cst_17 [0] : vector<4x2x128xf32> to vector<2x128xf32>
    %36 = arith.subf %32, %35 : vector<2x128xf32>
    %37 = arith.addf %23, %36 : vector<2x128xf32>
    %cst_18 = arith.constant 0.000000e+00 : f32
    %38 = vector.broadcast %cst_18 : f32 to vector<2x128xf32>
    %39 = arith.select %6, %37, %38 : vector<2x128xi1>, vector<2x128xf32>
    %cst_19 = arith.constant 1.000000e+00 : f32
    %cst_20 = arith.constant 0.000000e+00 : f32
    %40 = vector.broadcast %cst_19 : f32 to vector<2x128xf32>
    %41 = vector.broadcast %cst_20 : f32 to vector<2x128xf32>
    %42 = arith.select %6, %40, %41 : vector<2x128xi1>, vector<2x128xf32>
    %c0_21 = arith.constant 0 : index
    %c0_22 = arith.constant 0 : index
    %c0_23 = arith.constant 0 : index
    %c0_24 = arith.constant 0 : index
    %43 = vector.load %arg6[%c0_21, %c0_22, %c0_23, %c0_24] : memref<1x1x2x128xf32, #tpu.memory_space<vmem>>, vector<1x1x2x128xf32>
    %44 = vector.shape_cast %43 : vector<1x1x2x128xf32> to vector<2x128xf32>
    %45 = arith.addf %44, %39 : vector<2x128xf32>
    %c0_25 = arith.constant 0 : index
    %c0_26 = arith.constant 0 : index
    %c0_27 = arith.constant 0 : index
    %c0_28 = arith.constant 0 : index
    %46 = vector.load %arg6[%c0_25, %c0_26, %c0_27, %c0_28] : memref<1x1x2x128xf32, #tpu.memory_space<vmem>>, vector<1x1x2x128xf32>
    %47 = vector.shape_cast %46 : vector<1x1x2x128xf32> to vector<2x128xf32>
    %48 = vector.shape_cast %45 : vector<2x128xf32> to vector<1x1x2x128xf32>
    tpu.vector_store %arg6[%c0_25, %c0_26, %c0_27, %c0_28], %48 {strides = array<i32>} : memref<1x1x2x128xf32, #tpu.memory_space<vmem>>, vector<1x1x2x128xf32>,
    %c0_29 = arith.constant 0 : index
    %c0_30 = arith.constant 0 : index
    %c0_31 = arith.constant 0 : index
    %c0_32 = arith.constant 0 : index
    %49 = vector.load %arg7[%c0_29, %c0_30, %c0_31, %c0_32] : memref<1x1x2x128xf32, #tpu.memory_space<vmem>>, vector<1x1x2x128xf32>
    %50 = vector.shape_cast %49 : vector<1x1x2x128xf32> to vector<2x128xf32>
    %51 = arith.addf %50, %42 : vector<2x128xf32>
    %c0_33 = arith.constant 0 : index
    %c0_34 = arith.constant 0 : index
    %c0_35 = arith.constant 0 : index
    %c0_36 = arith.constant 0 : index
    %52 = vector.load %arg7[%c0_33, %c0_34, %c0_35, %c0_36] : memref<1x1x2x128xf32, #tpu.memory_space<vmem>>, vector<1x1x2x128xf32>
    %53 = vector.shape_cast %52 : vector<1x1x2x128xf32> to vector<2x128xf32>
    %54 = vector.shape_cast %51 : vector<2x128xf32> to vector<1x1x2x128xf32>
    tpu.vector_store %arg7[%c0_33, %c0_34, %c0_35, %c0_36], %54 {strides = array<i32>} : memref<1x1x2x128xf32, #tpu.memory_space<vmem>>, vector<1x1x2x128xf32>,
    return
  }
  func.func @transform_0(%arg0: i32, %arg1: i32, %arg2: i32) -> (i32, i32, i32, i32) {
    %c1_i32 = arith.constant 1 : i32
    %0 = arith.muli %arg1, %c1_i32 : i32
    %1 = arith.addi %0, %arg2 : i32
    %c0_i32 = arith.constant 0 : i32
    %c0_i32_0 = arith.constant 0 : i32
    %c0_i32_1 = arith.constant 0 : i32
    return %arg0, %c0_i32, %1, %c0_i32_0 : i32, i32, i32, i32
  }
  func.func @transform_1(%arg0: i32, %arg1: i32, %arg2: i32) -> (i32, i32, i32, i32) {
    %c1_i32 = arith.constant 1 : i32
    %0 = arith.muli %arg1, %c1_i32 : i32
    %1 = arith.addi %0, %arg2 : i32
    %c0_i32 = arith.constant 0 : i32
    %c0_i32_0 = arith.constant 0 : i32
    %c0_i32_1 = arith.constant 0 : i32
    return %arg0, %c0_i32, %1, %c0_i32_0 : i32, i32, i32, i32
  }
  func.func @transform_2(%arg0: i32, %arg1: i32, %arg2: i32) -> (i32, i32, i32) {
    %c1_i32 = arith.constant 1 : i32
    %0 = arith.muli %arg1, %c1_i32 : i32
    %1 = arith.addi %0, %arg2 : i32
    %c0_i32 = arith.constant 0 : i32
    %c0_i32_0 = arith.constant 0 : i32
    return %arg0, %1, %c0_i32 : i32, i32, i32
  }
  func.func @transform_3(%arg0: i32, %arg1: i32, %arg2: i32) -> (i32, i32, i32, i32) {
    %c0_i32 = arith.constant 0 : i32
    %c0_i32_0 = arith.constant 0 : i32
    %c0_i32_1 = arith.constant 0 : i32
    return %arg0, %arg1, %c0_i32, %c0_i32_0 : i32, i32, i32, i32
  }
  func.func @transform_4(%arg0: i32, %arg1: i32, %arg2: i32) -> (i32, i32, i32, i32) {
    %c0_i32 = arith.constant 0 : i32
    %c0_i32_0 = arith.constant 0 : i32
    %c0_i32_1 = arith.constant 0 : i32
    return %arg0, %arg1, %c0_i32, %c0_i32_0 : i32, i32, i32, i32
  }
}

</mosaic_0001>

<bundles_post_ra>
// kernel: cross_entropy_loss_aux.1
= control target key start
LH: loop header
LB: loop body
LE: loop exit
PB: predicated region body
PF: predicated region fallthrough
CT: control target
= control target key end

     0   :  { %s708_s15 = smov 0   ;;  %s710_s16 = smov 0   ;;  %s799_s0 = inlined_call_operand.vmem [shape: f32[2,4,2,128], index: 0, kind: input, shape index: {}]   ;;  %s800_s1 = inlined_call_operand.vmem [shape: f32[2,4,2,128], index: 1, kind: input, shape index: {}]   ;;  %s801_s2 = inlined_call_operand.vmem [shape: s32[2,2,128], index: 2, kind: input, shape index: {}]   ;;  %s802_s3 = inlined_call_operand.vmem [shape: f32[2,1,2,128], index: 3, kind: output, shape index: {0}]   ;;  %s803_s4 = inlined_call_operand.vmem [shape: f32[2,1,2,128], index: 4, kind: output, shape index: {1}]  }
   0x1   :  { %s712_s17 = smov 0  }
   0x2 LB: > { %s34_s18 = sadd.s32 1, %s676_s16  ;;  %p601_p0 = scmp.ge.s32.totalorder %s680_s17, 1  ;;  %s680_s17 = sphi %s712_s17, %s15_s17   ;;  %s676_s16 = sphi %s710_s16, %s805_s16   ;;  %s672_s15 = sphi %s708_s15, %s804_s15  }
   0x3   : > { %p36_p1 = scmp.ge.s32.totalorder %s34_s18, 2  ;;  %p234_p2 = scmp.lt.s32.totalorder %s680_s17, 3 }
   0x5   : > { %s807_s18 = smov (%p36_p1, %s34_s18), 0  ;;  %p235_p3 = pnand %p601_p0, %p234_p2 }
   0x6   : > { %p291_p4 = scmp.lt.s32.totalorder (!%p235_p3), %s672_s15, 1 }
   0x7   : > { %238 = sbr.rel (%p235_p3) target bundleno = 76 (0x4c), region = 32 }
   0xc   : > { %s809_s15 = smov (!%p291_p4, %s672_s15), 1  ;;  %vm349_vm0 = vcmask 1041408   ;;  %v682_v3 = vmov 0.0  }
   0xd   : > { %s611_s19 = sshll.u32 %s809_s15, 3  ;;  %s606_s20 = sshll.u32 %s809_s15, 1 }
   0xe   : > { %s298_s23 = scalar_lea.vmem %s799_s0, %s611_s19  ;;  %s308_s26 = scalar_lea.vmem %s800_s1, %s611_s19 }
   0xf   : > { %s317_s29 = scalar_lea.vmem %s801_s2, %s606_s20  ;;  %s738_s6 = scalar_lea.vmem %s802_s3, %s606_s20  ;;  %v345_v0 = vld [vmem:[%s298_s23] sm:$0x3]  ;;  %v346_v1 = vld [vmem:[%s298_s23 + $0x2] sm:$0x3]  ;;  %v347_v2 = vld [vmem:[%s298_s23 + $0x4] sm:$0x3] }
  0x10   : > { %337 = vst [vmem:[%s738_s6] sm:$0x3] %v682_v3  ;;  %v348_v4 = vld [vmem:[%s298_s23 + $0x6] sm:$0x3]  ;;  %v350_v5 = vsel %vm349_vm0, %v345_v0, -inf  ;;  %v351_v6 = vsel %vm349_vm0, %v346_v1, -inf  ;;  %s746_s9 = scalar_lea.vmem %s803_s4, %s606_s20  ;;  %v352_v9 = vsel %vm349_vm0, %v347_v2, -inf }
  0x11   : > { %v748_v7 = vld [vmem:[%s317_s29] sm:$0x3]  ;;  %338 = vst [vmem:[%s746_s9] sm:$0x3] %v682_v3  ;;  %v353_v10 = vsel %vm349_vm0, %v348_v4, -inf  ;;  %v354_v11 = vmax.f32 %v350_v5, %v351_v6  ;;  %v391_v12 = vld [vmem:[%s308_s26 + $0x2] sm:$0x3] }
  0x12   : > { %v390_v8 = vld [vmem:[%s308_s26] sm:$0x3]  ;;  %vm340_vm1 = vcmp.ne.s32.totalorder %v748_v7, 255  ;;  %v355_v13 = vmax.f32 %v352_v9, %v353_v10  ;;  %v392_v14 = vld [vmem:[%s308_s26 + $0x4] sm:$0x3]  ;;  %v395_v17 = vsel %vm349_vm0, %v391_v12, -inf }
  0x13   : > { %v393_v15 = vld [vmem:[%s308_s26 + $0x6] sm:$0x3]  ;;  %v394_v16 = vsel %vm349_vm0, %v390_v8, -inf  ;;  %v396_v18 = vsel %vm349_vm0, %v392_v14, -inf  ;;  %v436_v23 = vsel %vm340_vm1, 1.0, %v682_v3  ;;  %vm341_vm2 = vcmp.eq.s32.totalorder %v748_v7, 0 }
  0x14   : > { %v397_v19 = vsel %vm349_vm0, %v393_v15, -inf  ;;  %v398_v20 = vmax.f32 %v394_v16, %v395_v17  ;;  %v356_v21 = vmax.f32 %v354_v11, %v355_v13  ;;  %vm342_vm3 = vcmp.eq.s32.totalorder %v748_v7, 1 }
  0x15   : > { %v399_v22 = vmax.f32 %v396_v18, %v397_v19  ;;  %vm343_vm4 = vcmp.eq.s32.totalorder %v748_v7, 2  ;;  %vm344_vm5 = vcmp.eq.s32.totalorder %v748_v7, 3 }
  0x16   : > { %v357_v24 = vsub.f32 %v345_v0, %v356_v21  ;;  %v358_v25 = vsub.f32 %v346_v1, %v356_v21  ;;  %v359_v26 = vsub.f32 %v347_v2, %v356_v21  ;;  %v760_v27 = vsub.f32 %v348_v4, %v356_v21 }
  0x17   : > { %v400_v28 = vmax.f32 %v398_v20, %v399_v22 }
  0x18   : > { %v440_v29 = vld [vmem:[%s746_s9] sm:$0x3]  ;;  %v361_v30 = vmul.f32 1.442695, %v357_v24  ;;  %v363_v31 = vmul.f32 1.442695, %v358_v25 }
  0x19   : > { %v365_v32 = vmul.f32 1.442695, %v359_v26  ;;  %v441_v33 = vadd.f32 %v440_v29, %v436_v23  ;;  %v367_v34 = vmul.f32 1.442695, %v760_v27  ;;  %v401_v35 = vsub.f32 %v390_v8, %v400_v28 }
  0x1a   : > { %638 = vpow2.f32 %v361_v30  ;;  %v402_v36 = vsub.f32 %v391_v12, %v400_v28  ;;  %v403_v37 = vsub.f32 %v392_v14, %v400_v28  ;;  %v404_v38 = vsub.f32 %v393_v15, %v400_v28 }
  0x1b   : > { %442 = vst [vmem:[%s746_s9] sm:$0x3] %v441_v33  ;;  %640 = vpow2.f32 %v363_v31  ;;  %v405_v39 = vmul.f32 1.442695, %v401_v35  ;;  %v378_v63 = vsel %vm341_vm2, %v357_v24, 0.0  ;;  %v379_v0 = vsel %vm342_vm3, %v358_v25, 0.0 }
  0x1c   : > { %642 = vpow2.f32 %v365_v32  ;;  %v407_v40 = vmul.f32 1.442695, %v402_v36  ;;  %v409_v41 = vmul.f32 1.442695, %v403_v37  ;;  %v411_v42 = vmul.f32 1.442695, %v404_v38 }
  0x1d   : > { %644 = vpow2.f32 %v367_v34  ;;  %v422_v2 = vsel %vm341_vm2, %v401_v35, 0.0  ;;  %v423_v3 = vsel %vm342_vm3, %v402_v36, 0.0  ;;  %v382_v5 = vsel %vm349_vm0, %v378_v63, 0.0  ;;  %v437_v31 = vld [vmem:[%s738_s6] sm:$0x3] }
  0x1e   : > { %646 = vpow2.f32 %v405_v39  ;;  %v383_v6 = vsel %vm349_vm0, %v379_v0, 0.0  ;;  %v380_v8 = vsel %vm343_vm4, %v359_v26, 0.0  ;;  %v426_v9 = vsel %vm349_vm0, %v422_v2, 0.0 }
  0x1f   : > { %648 = vpow2.f32 %v407_v40  ;;  %v427_v10 = vsel %vm349_vm0, %v423_v3, 0.0  ;;  %v424_v11 = vsel %vm343_vm4, %v403_v37, 0.0  ;;  %v384_v12 = vadd.f32 %v383_v6, %v382_v5 }
  0x20   : > { %650 = vpow2.f32 %v409_v41  ;;  %v385_v13 = vsel %vm349_vm0, %v380_v8, 0.0  ;;  %v381_v14 = vsel %vm344_vm5, %v760_v27, 0.0  ;;  %v428_v15 = vadd.f32 %v427_v10, %v426_v9 }
  0x21   : > { %652 = vpow2.f32 %v411_v42  ;;  %v429_v16 = vsel %vm349_vm0, %v424_v11, 0.0  ;;  %v386_v17 = vadd.f32 %v385_v13, %v384_v12  ;;  %v425_v18 = vsel %vm344_vm5, %v404_v38, 0.0 }
  0x22   : > { %v387_v19 = vsel %vm349_vm0, %v381_v14, 0.0  ;;  %v430_v20 = vadd.f32 %v429_v16, %v428_v15  ;;  %v431_v22 = vsel %vm349_vm0, %v425_v18, 0.0 }
  0x23   : > { %v388_v24 = vadd.f32 %v387_v19, %v386_v17 }
  0x24   : > { %v432_v25 = vadd.f32 %v431_v22, %v430_v20 }
  0x27   : > { %v639_v43 = vpop.eup %638 }
  0x28   : > { %v641_v44 = vpop.eup %640  ;;  %v369_v45 = vsel %vm349_vm0, %v639_v43, 0.0 }
  0x29   : > { %v643_v46 = vpop.eup %642  ;;  %v370_v47 = vsel %vm349_vm0, %v641_v44, 0.0 }
  0x2a   : > { %v645_v48 = vpop.eup %644  ;;  %v371_v49 = vadd.f32 %v370_v47, %v369_v45  ;;  %v372_v50 = vsel %vm349_vm0, %v643_v46, 0.0 }
  0x2b   : > { %v647_v51 = vpop.eup %646  ;;  %v374_v52 = vsel %vm349_vm0, %v645_v48, 0.0 }
  0x2c   : > { %v649_v53 = vpop.eup %648  ;;  %v373_v54 = vadd.f32 %v372_v50, %v371_v49  ;;  %v413_v55 = vsel %vm349_vm0, %v647_v51, 0.0 }
  0x2d   : > { %v651_v56 = vpop.eup %650  ;;  %v414_v57 = vsel %vm349_vm0, %v649_v53, 0.0 }
  0x2e   : > { %v653_v58 = vpop.eup %652  ;;  %v375_v59 = vadd.f32 %v374_v52, %v373_v54  ;;  %v415_v60 = vadd.f32 %v414_v57, %v413_v55  ;;  %v416_v61 = vsel %vm349_vm0, %v651_v56, 0.0 }
  0x2f   : > { %v418_v62 = vsel %vm349_vm0, %v653_v58, 0.0 }
  0x30   : > { %654 = vlog2.f32 %v375_v59  ;;  %v417_v1 = vadd.f32 %v416_v61, %v415_v60 }
  0x32   : > { %v419_v4 = vadd.f32 %v418_v62, %v417_v1 }
  0x34   : > { %656 = vlog2.f32 %v419_v4 }
  0x3d   : > { %v655_v21 = vpop.eup %654 }
  0x3e   : > { %v377_v23 = vmul.f32 0.6931472, %v655_v21 }
  0x40   : > { %v389_v28 = vsub.f32 %v377_v23, %v388_v24 }
  0x41   : > { %v657_v26 = vpop.eup %656 }
  0x42   : > { %v421_v29 = vmul.f32 0.6931472, %v657_v26 }
  0x44   : > { %v433_v27 = vsub.f32 %v421_v29, %v432_v25 }
  0x46   : > { %v434_v30 = vadd.f32 %v433_v27, %v389_v28 }
  0x48   : > { %v435_v32 = vsel %vm340_vm1, %v434_v30, 0.0 }
  0x49   : > { %v438_v33 = vadd.f32 %v437_v31, %v435_v32 }
  0x4b   : > { %439 = vst [vmem:[%s738_s6] sm:$0x3] %v438_v33 }
  0x4c PF: > { %s15_s17 = sadd.s32 1, %s680_s17   ;;  %s804_s15 = smov %s676_s16 }
  0x4d   : > { %p12_p5 = scmp.ge.s32.totalorder %s15_s17, 4   ;;  %s805_s16 = smov %s807_s18 }
  0x4f   :  { %14 = sbr.rel (!%p12_p5) target bundleno = 2 (0x2), region = 84 }

</bundles_post_ra>
